<compile_context>
chip_gen: v6e
topology: v6e:2x2x1
jax: 0.10.0
libtpu: 0.0.40
codegen_flags: <defaults>
</compile_context>

<pallas_src>
import jax
import jax.numpy as jnp
from jax.experimental import pallas as pl
from jax.experimental.pallas import tpu as pltpu


def _round_up(n, m):
    return ((n + m - 1) // m) * m


def _cdiv(a, b):
    return -(-a // b)


def _default_bf16_elementwise():
    """bf16 VPU elementwise only on v6e / v7x; f32 elsewhere (v5e has no bf16 VPU)."""
    try:
        kind = jax.devices()[0].device_kind.lower()
    except Exception:
        return False
    return ("v6" in kind) or ("v7" in kind)


def _make_kernel(bf16_elementwise):
    ew = jnp.bfloat16 if bf16_elementwise else jnp.float32

    def kernel(x_ref, w1_ref, b1_ref, w2_ref, b2_ref, w3_ref, b3_ref, o_ref):
        # x tile: (TB, in) f32 -> bf16 for the MXU.
        x = x_ref[...].astype(jnp.bfloat16)

        # Layer 1: (TB, in) @ (in, 128), f32 accumulate.
        h1 = jnp.dot(x, w1_ref[...], preferred_element_type=jnp.float32)
        # bias + ReLU fused into the cast: only the bf16 h1 needs to materialize.
        h1 = jnp.maximum(h1.astype(ew) + b1_ref[...], 0.0).astype(jnp.bfloat16)

        # Layer 2: (TB, 128) @ (128, 128)  (columns 64..127 are zero-padded).
        h2 = jnp.dot(h1, w2_ref[...], preferred_element_type=jnp.float32)
        h2 = jnp.maximum(h2.astype(ew) + b2_ref[...], 0.0)

        # Layer 3 (out_features=1): VPU multiply + XLU lane reduction in f32
        # instead of an N=1 MXU matmul; w3 stays f32 (never touches the MXU).
        logits = jnp.sum(h2.astype(jnp.float32) * w3_ref[...],
                         axis=-1, keepdims=True)                     # (TB, 1)
        o_ref[...] = jax.nn.sigmoid(logits + b3_ref[...]).astype(o_ref.dtype)

    return kernel


def fraud_detection_forward(x, params, *, block_rows=8192, bf16_elementwise=None):
    """x: (B, input_size) float32 -> (B, 1) float32 fraud scores."""
    if bf16_elementwise is None:
        bf16_elementwise = _default_bf16_elementwise()
    ew = jnp.bfloat16 if bf16_elementwise else jnp.float32

    w1, b1, w2, b2, w3, b3 = params
    B, in_features = x.shape
    h1_dim = w1.shape[1]          # 128
    h2_dim = w2.shape[1]          # 64
    h2_pad = 128                  # pad hidden-2 to the native 128-lane width

    # --- batch tiling -------------------------------------------------------
    # tile rows: multiple of 8; tile count: >= 2 (and even) so both v7x
    # TensorCores get balanced work; tail rows are zero-padded and sliced off.
    block_rows = max(8, int(block_rows))
    tb_req = max(8, _round_up(min(block_rows, B), 8))
    num_tiles = _cdiv(B, tb_req)
    if B > 8:
        num_tiles = max(num_tiles, 2)
    if num_tiles > 1 and num_tiles % 2 == 1:
        num_tiles += 1
    tb = _round_up(_cdiv(B, num_tiles), 8)
    b_pad = num_tiles * tb
    if b_pad != B:
        x = jnp.pad(x, ((0, b_pad - B), (0, 0)))

    # --- VMEM budget (lane-padded accounting) -------------------------------
    lane_row_bytes = 128 * 4
    vmem_budget = (
        2 * tb * lane_row_bytes        # x double buffer: (tb, in<=128) padded to 128 lanes
        + 2 * tb * lane_row_bytes      # (tb, 1) output blocks, lane-padded, double buffered
        + 6 * tb * lane_row_bytes      # h1/h2 f32 + bf16 temporaries headroom
        + 4 * 1024 * 1024              # weights/biases + slack
    )
    vmem_limit = int(min(max(32 * 1024 * 1024, vmem_budget), 96 * 1024 * 1024))

    # --- weights: bf16 MXU operands; hidden-2 zero-padded to 128 lanes -------
    w1_bf = w1.astype(jnp.bfloat16)                                          # (in, 128)
    w2_bf = jnp.pad(w2, ((0, 0), (0, h2_pad - h2_dim))).astype(jnp.bfloat16)  # (128, 128)
    b1_k = b1.astype(ew)                                                      # (1, 128)
    b2_k = jnp.pad(b2, ((0, 0), (0, h2_pad - h2_dim))).astype(ew)             # (1, 128)
    w3_row = jnp.pad(w3.reshape(1, h2_dim),
                     ((0, 0), (0, h2_pad - h2_dim))).astype(jnp.float32)      # (1, 128) f32
    b3_k = b3.astype(jnp.float32)                                             # (1, 1)

    # Full-array blocks with constant index_map -> weights stay resident in VMEM.
    def full(a):
        return pl.BlockSpec(a.shape, lambda i: (0,) * a.ndim)

    flops = 2 * b_pad * (in_features * h1_dim + h1_dim * h2_pad + h2_pad)
    bytes_accessed = (b_pad * in_features * 4 + b_pad * 4
                      + w1_bf.size * 2 + w2_bf.size * 2 + w3_row.size * 4
                      + b1_k.size * b1_k.dtype.itemsize
                      + b2_k.size * b2_k.dtype.itemsize + b3_k.size * 4)

    out = pl.pallas_call(
        _make_kernel(bf16_elementwise),
        out_shape=jax.ShapeDtypeStruct((b_pad, 1), jnp.float32),
        grid=(num_tiles,),
        in_specs=[
            pl.BlockSpec((tb, in_features), lambda i: (i, 0)),   # x tile streams
            full(w1_bf), full(b1_k), full(w2_bf), full(b2_k),
            full(w3_row), full(b3_k),
        ],
        out_specs=pl.BlockSpec((tb, 1), lambda i: (i, 0)),
        compiler_params=pltpu.CompilerParams(
            dimension_semantics=("parallel",),          # shard batch across TCs
            vmem_limit_bytes=vmem_limit,
        ),
        cost_estimate=pl.CostEstimate(
            flops=flops, transcendentals=b_pad, bytes_accessed=bytes_accessed),
    )(x, w1_bf, b1_k, w2_bf, b2_k, w3_row, b3_k)

    return out[:B]


def init_params(key, input_size):
    """Deterministic init matching the PyTorch module's shapes.

    Weights are stored (in_features, out_features) so the kernel computes
    x @ W + b (== PyTorch x @ W.T + b with W of shape (out, in))."""
    k1, k2, k3, k4, k5, k6 = jax.random.split(key, 6)

    def lin(kw, kb, fan_in, fan_out):
        bound = 1.0 / jnp.sqrt(fan_in)
        w = jax.random.uniform(kw, (fan_in, fan_out), jnp.float32, -bound, bound)
        b = jax.random.uniform(kb, (1, fan_out), jnp.float32, -bound, bound)
        return w, b

    w1, b1 = lin(k1, k2, input_size, 128)
    w2, b2 = lin(k3, k4, 128, 64)
    w3, b3 = lin(k5, k6, 64, 1)
    return (w1, b1, w2, b2, w3, b3)


if __name__ == "__main__":
    key = jax.random.PRNGKey(0)
    kx, kp = jax.random.split(key)

    batch, input_size = 1000, 32          # non-multiple batch exercises padding
    x = jax.random.normal(kx, (batch, input_size), jnp.float32)
    params = init_params(kp, input_size)

    use_bf16_ew = _default_bf16_elementwise()

    # Small tile in the demo -> 4 grid steps (multi-tile + even-count + tail-pad path).
    out = fraud_detection_forward(x, params, block_rows=256,
                                  bf16_elementwise=use_bf16_ew)
    out = jax.block_until_ready(out)
    assert out.shape == (batch, 1)

    w1, b1, w2, b2, w3, b3 = params
    bf = jnp.bfloat16

    # Reference matching the kernel's numerics.
    if use_bf16_ew:
        r1 = jnp.dot(x.astype(bf), w1.astype(bf), preferred_element_type=jnp.float32)
        r1 = jnp.maximum(r1.astype(bf) + b1.astype(bf), 0.0).astype(bf)
        r2 = jnp.dot(r1, w2.astype(bf), preferred_element_type=jnp.float32)
        r2 = jnp.maximum(r2.astype(bf) + b2.astype(bf), 0.0).astype(jnp.float32)
    else:
        r1 = jnp.maximum(jnp.dot(x.astype(bf), w1.astype(bf),
                                 preferred_element_type=jnp.float32) + b1, 0.0)
        r2 = jnp.maximum(jnp.dot(r1.astype(bf), w2.astype(bf),
                                 preferred_element_type=jnp.float32) + b2, 0.0)
    ref_matched = jax.nn.sigmoid(r2 @ w3 + b3)
    assert jnp.allclose(out, ref_matched, atol=5e-3), "mismatch vs kernel-matched reference"

    # Full-f32 reference (looser tolerance; difference is bf16 operand rounding).
    f1 = jnp.maximum(x @ w1 + b1, 0.0)
    f2 = jnp.maximum(f1 @ w2 + b2, 0.0)
    ref32 = jax.nn.sigmoid(f2 @ w3 + b3)
    assert jnp.allclose(out, ref32, atol=3e-2), "mismatch vs f32 reference"

    print("KERNEL_OK")
</pallas_src>

<mosaic_0001>
module attributes {stable_mosaic.version = 11 : i64} {
  func.func @kernel(%arg0: i32, %arg1: memref<256x32xf32, #tpu.memory_space<vmem>>, %arg2: memref<32x128xbf16, #tpu.memory_space<vmem>>, %arg3: memref<1x128xf32, #tpu.memory_space<vmem>>, %arg4: memref<128x128xbf16, #tpu.memory_space<vmem>>, %arg5: memref<1x128xf32, #tpu.memory_space<vmem>>, %arg6: memref<1x128xf32, #tpu.memory_space<vmem>>, %arg7: memref<1x1xf32, #tpu.memory_space<vmem>>, %arg8: memref<256x1xf32, #tpu.memory_space<vmem>>) attributes {dimension_semantics = [#tpu.dimension_semantics<parallel>], iteration_bounds = array<i64: 4>, scalar_prefetch = 0 : i64, scratch_operands = 0 : i64, tpu.core_type = #tpu.core_type<tc>, window_params = [{transform_indices = @transform_0, window_bounds = array<i64: 256, 32>}, {pipeline_mode = #tpu.pipeline_mode<synchronous>, transform_indices = @transform_1, window_bounds = array<i64: 32, 128>}, {pipeline_mode = #tpu.pipeline_mode<synchronous>, transform_indices = @transform_2, window_bounds = array<i64: 1, 128>}, {pipeline_mode = #tpu.pipeline_mode<synchronous>, transform_indices = @transform_3, window_bounds = array<i64: 128, 128>}, {pipeline_mode = #tpu.pipeline_mode<synchronous>, transform_indices = @transform_4, window_bounds = array<i64: 1, 128>}, {pipeline_mode = #tpu.pipeline_mode<synchronous>, transform_indices = @transform_5, window_bounds = array<i64: 1, 128>}, {pipeline_mode = #tpu.pipeline_mode<synchronous>, transform_indices = @transform_6, window_bounds = array<i64: 1, 1>}, {transform_indices = @transform_7, window_bounds = array<i64: 256, 1>}]} {
    %c0 = arith.constant 0 : index
    %c0_0 = arith.constant 0 : index
    %0 = vector.load %arg1[%c0, %c0_0] : memref<256x32xf32, #tpu.memory_space<vmem>>, vector<256x32xf32>
    %1 = arith.truncf %0 : vector<256x32xf32> to vector<256x32xbf16>
    %c0_1 = arith.constant 0 : index
    %c0_2 = arith.constant 0 : index
    %2 = vector.load %arg2[%c0_1, %c0_2] : memref<32x128xbf16, #tpu.memory_space<vmem>>, vector<32x128xbf16>
    %cst = arith.constant dense<0.000000e+00> : vector<256x128xf32>
    %3 = tpu.matmul %1, %2, %cst {dimension_numbers = #tpu.dot_dimension_numbers<[1], [0], [0], [1], [0, 0, 1, 1], [], []>} : vector<256x32xbf16>, vector<32x128xbf16>, vector<256x128xf32> -> vector<256x128xf32>
    %c0_3 = arith.constant 0 : index
    %c0_4 = arith.constant 0 : index
    %4 = vector.load %arg3[%c0_3, %c0_4] : memref<1x128xf32, #tpu.memory_space<vmem>>, vector<1x128xf32>
    %5 = vector.broadcast %4 : vector<1x128xf32> to vector<256x128xf32>
    %6 = arith.addf %3, %5 : vector<256x128xf32>
    %cst_5 = arith.constant 0.000000e+00 : f32
    %7 = vector.broadcast %cst_5 : f32 to vector<256x128xf32>
    %8 = arith.maximumf %6, %7 : vector<256x128xf32>
    %9 = arith.truncf %8 : vector<256x128xf32> to vector<256x128xbf16>
    %c0_6 = arith.constant 0 : index
    %c0_7 = arith.constant 0 : index
    %10 = vector.load %arg4[%c0_6, %c0_7] : memref<128x128xbf16, #tpu.memory_space<vmem>>, vector<128x128xbf16>
    %cst_8 = arith.constant dense<0.000000e+00> : vector<256x128xf32>
    %11 = tpu.matmul %9, %10, %cst_8 {dimension_numbers = #tpu.dot_dimension_numbers<[1], [0], [0], [1], [0, 0, 1, 1], [], []>} : vector<256x128xbf16>, vector<128x128xbf16>, vector<256x128xf32> -> vector<256x128xf32>
    %c0_9 = arith.constant 0 : index
    %c0_10 = arith.constant 0 : index
    %12 = vector.load %arg5[%c0_9, %c0_10] : memref<1x128xf32, #tpu.memory_space<vmem>>, vector<1x128xf32>
    %13 = vector.broadcast %12 : vector<1x128xf32> to vector<256x128xf32>
    %14 = arith.addf %11, %13 : vector<256x128xf32>
    %cst_11 = arith.constant 0.000000e+00 : f32
    %15 = vector.broadcast %cst_11 : f32 to vector<256x128xf32>
    %16 = arith.maximumf %14, %15 : vector<256x128xf32>
    %c0_12 = arith.constant 0 : index
    %c0_13 = arith.constant 0 : index
    %17 = vector.load %arg6[%c0_12, %c0_13] : memref<1x128xf32, #tpu.memory_space<vmem>>, vector<1x128xf32>
    %18 = vector.broadcast %17 : vector<1x128xf32> to vector<256x128xf32>
    %19 = arith.mulf %16, %18 : vector<256x128xf32>
    %cst_14 = arith.constant dense<0.000000e+00> : vector<256xf32>
    %20 = vector.multi_reduction <add>, %19, %cst_14 [1] : vector<256x128xf32> to vector<256xf32>
    %21 = vector.shape_cast %20 : vector<256xf32> to vector<256x1xf32>
    %c0_15 = arith.constant 0 : index
    %c0_16 = arith.constant 0 : index
    %22 = vector.load %arg7[%c0_15, %c0_16] : memref<1x1xf32, #tpu.memory_space<vmem>>, vector<1x1xf32>
    %23 = vector.broadcast %22 : vector<1x1xf32> to vector<256x1xf32>
    %24 = arith.addf %21, %23 : vector<256x1xf32>
    %25 = arith.negf %24 : vector<256x1xf32>
    %26 = math.exp %25 : vector<256x1xf32>
    %cst_17 = arith.constant 1.000000e+00 : f32
    %27 = vector.broadcast %cst_17 : f32 to vector<256x1xf32>
    %28 = arith.addf %27, %26 : vector<256x1xf32>
    %29 = arith.divf %27, %28 : vector<256x1xf32>
    %c0_18 = arith.constant 0 : index
    %c0_19 = arith.constant 0 : index
    %30 = vector.load %arg8[%c0_18, %c0_19] : memref<256x1xf32, #tpu.memory_space<vmem>>, vector<256x1xf32>
    tpu.vector_store %arg8[%c0_18, %c0_19], %29 {strides = array<i32>} : memref<256x1xf32, #tpu.memory_space<vmem>>, vector<256x1xf32>,
    return
  }
  func.func @transform_0(%arg0: i32) -> (i32, i32) {
    %c0_i32 = arith.constant 0 : i32
    %c0_i32_0 = arith.constant 0 : i32
    return %arg0, %c0_i32 : i32, i32
  }
  func.func @transform_1(%arg0: i32) -> (i32, i32) {
    %c0_i32 = arith.constant 0 : i32
    %c0_i32_0 = arith.constant 0 : i32
    %c0_i32_1 = arith.constant 0 : i32
    return %c0_i32, %c0_i32_0 : i32, i32
  }
  func.func @transform_2(%arg0: i32) -> (i32, i32) {
    %c0_i32 = arith.constant 0 : i32
    %c0_i32_0 = arith.constant 0 : i32
    %c0_i32_1 = arith.constant 0 : i32
    return %c0_i32, %c0_i32_0 : i32, i32
  }
  func.func @transform_3(%arg0: i32) -> (i32, i32) {
    %c0_i32 = arith.constant 0 : i32
    %c0_i32_0 = arith.constant 0 : i32
    %c0_i32_1 = arith.constant 0 : i32
    return %c0_i32, %c0_i32_0 : i32, i32
  }
  func.func @transform_4(%arg0: i32) -> (i32, i32) {
    %c0_i32 = arith.constant 0 : i32
    %c0_i32_0 = arith.constant 0 : i32
    %c0_i32_1 = arith.constant 0 : i32
    return %c0_i32, %c0_i32_0 : i32, i32
  }
  func.func @transform_5(%arg0: i32) -> (i32, i32) {
    %c0_i32 = arith.constant 0 : i32
    %c0_i32_0 = arith.constant 0 : i32
    %c0_i32_1 = arith.constant 0 : i32
    return %c0_i32, %c0_i32_0 : i32, i32
  }
  func.func @transform_6(%arg0: i32) -> (i32, i32) {
    %c0_i32 = arith.constant 0 : i32
    %c0_i32_0 = arith.constant 0 : i32
    %c0_i32_1 = arith.constant 0 : i32
    return %c0_i32, %c0_i32_0 : i32, i32
  }
  func.func @transform_7(%arg0: i32) -> (i32, i32) {
    %c0_i32 = arith.constant 0 : i32
    %c0_i32_0 = arith.constant 0 : i32
    return %arg0, %c0_i32 : i32, i32
  }
}

</mosaic_0001>

<bundles_post_ra>
// kernel: tpu_custom_call.1
= control target key start
LH: loop header
LB: loop body
LE: loop exit
PB: predicated region body
PF: predicated region fallthrough
CT: control target
= control target key end

     0   :  { %s1713_s26 = smov 0   ;;  %s2028_s0 = inlined_call_operand.vmem [shape: f32[1024,32], index: 0, kind: input, shape index: {}]   ;;  %s2029_s1 = inlined_call_operand.vmem [shape: bf16[32,128], index: 1, kind: input, shape index: {}]   ;;  %s2030_s2 = inlined_call_operand.vmem [shape: f32[1,128], index: 2, kind: input, shape index: {}]   ;;  %s2031_s3 = inlined_call_operand.vmem [shape: bf16[128,128], index: 3, kind: input, shape index: {}]   ;;  %s2032_s4 = inlined_call_operand.vmem [shape: f32[1,128], index: 4, kind: input, shape index: {}]   ;;  %s2033_s5 = inlined_call_operand.vmem [shape: f32[1,128], index: 5, kind: input, shape index: {}]   ;;  %s2034_s6 = inlined_call_operand.<no memory space> [shape: f32[1,1], index: 6, kind: input, shape index: {}]   ;;  %s2035_s7 = inlined_call_operand.vmem [shape: f32[1024,1], index: 7, kind: output, shape index: {}]  }
   0x1   :  { %v12_v0 = vstv %s2034_s6 }
   0x2   :  { %13 = vst [vmem:[#allocation2] sm:$0x1] %v12_v0 }
   0x3 LB: > { %s1301_s27 = sadd.s32 4294967295, %s1668_s26   ;;  %p1305_p0 = scmp.ge.s32.totalorder %s1668_s26, 1  ;;  %s1668_s26 = sphi %s1713_s26, %s19_s26  }
   0x4   : > { %p240_p1 = scmp.lt.s32.totalorder %s1668_s26, 5 }
   0x6   : > { %p241_p2 = pnand %p1305_p0, %p240_p1 }
   0x7   : > { %s1306_s6 = sshll.u32 (!%p241_p2), %s1301_s27, 5 }
   0x8   : > { %244 = sbr.rel (%p241_p2) target bundleno = 666 (0x29a), region = 48  ;;  %p273_p3 = scmp.lt.s32.totalorder (!%p241_p2), %s1306_s6, 127 }
   0xd   : > { %v1524_v1 = vld [vmem:[%s2029_s1 + $0x8] sm:$0xff]   ;;  %v1525_v2 = vld [vmem:[%s2029_s1] sm:$0xff]   ;;  %v1526_v3 = vld [vmem:[%s2031_s3 + $0x38] sm:$0xff]   ;;  %s2037_s6 = smov (!%p273_p3, %s1306_s6), 127  ;;  %vm356_vm0 = vcmask 261120   ;;  %vm1212_vm1 = vcmask 7168  }
   0xe   : > { %1416 = vmatprep.subr.bf16.mxu0 %v1524_v1  ;;  %v1527_v4 = vld [vmem:[%s2031_s3 + $0x30] sm:$0xff]   ;;  %1500 = vmatprep.subr.bf16.mxu1 %v1526_v3  ;;  %s1307_s13 = sshll.u32 %s2037_s6, 3  ;;  %v1528_v5 = vld [vmem:[%s2031_s3 + $0x28] sm:$0xff]   ;;  %v1529_v17 = vld [vmem:[%s2031_s3 + $0x20] sm:$0xff]  }
   0xf   : > { %1417 = vmatpush3.bf16.msra.mxu0 %v1524_v1  ;;  %1508 = vmatpush3.bf16.msra.mxu1 %v1526_v3  ;;  %s1741_s16 = scalar_lea.vmem %s2028_s0, %s1307_s13  ;;  %v1530_v22 = vld [vmem:[%s2031_s3 + $0x18] sm:$0xff]   ;;  %v1531_v25 = vld [vmem:[%s2031_s3 + $0x10] sm:$0xff]   ;;  %v1532_v57 = vld [vmem:[%s2031_s3 + $0x8] sm:$0xff]  }
  0x10   : > { %1418 = vmatprep.subr.bf16.mxu0 %v1525_v2  ;;  %1501 = vmatprep.subr.bf16.mxu1 %v1527_v4  ;;  %v285_v6 = vld [vmem:[%s1741_s16] sm:$0xff]  ;;  %v286_v7 = vld [vmem:[%s1741_s16 + $0x8] sm:$0xff]  ;;  %v287_v8 = vld [vmem:[%s1741_s16 + $0x10] sm:$0xff] }
  0x11   : > { %v317_v9 = vpack.c.bf16 %v286_v7, %v285_v6  ;;  %v288_v10 = vld [vmem:[%s1741_s16 + $0x18] sm:$0xff]  ;;  %v289_v11 = vld [vmem:[%s1741_s16 + $0x20] sm:$0xff]  ;;  %v290_v12 = vld [vmem:[%s1741_s16 + $0x28] sm:$0xff] }
  0x12   : > { %v318_v13 = vpack.c.bf16 %v288_v10, %v287_v8  ;;  %v319_v14 = vpack.c.bf16 %v290_v12, %v289_v11  ;;  %v291_v15 = vld [vmem:[%s1741_s16 + $0x30] sm:$0xff]  ;;  %v292_v16 = vld [vmem:[%s1741_s16 + $0x38] sm:$0xff]  ;;  %v293_v18 = vld [vmem:[%s1741_s16 + $0x40] sm:$0xff] }
  0x13   : > { %1419 = vmatpush3.bf16.msra.mxu0 %v1525_v2  ;;  %1509 = vmatpush3.bf16.msra.mxu1 %v1527_v4  ;;  %v294_v19 = vld [vmem:[%s1741_s16 + $0x48] sm:$0xff]  ;;  %v320_v20 = vpack.c.bf16 %v292_v16, %v291_v15  ;;  %v295_v23 = vld [vmem:[%s1741_s16 + $0x50] sm:$0xff]  ;;  %v296_v24 = vld [vmem:[%s1741_s16 + $0x58] sm:$0xff] }
  0x14   : > { %1452 = vmatprep.subr.bf16.mxu0 %v1526_v3  ;;  %1420 = vmatprep.mubr.msk.bf16.mxu0 %vm356_vm0, %v317_v9  ;;  %v321_v21 = vpack.c.bf16 %v294_v19, %v293_v18  ;;  %v297_v26 = vld [vmem:[%s1741_s16 + $0x60] sm:$0xff]  ;;  %v298_v27 = vld [vmem:[%s1741_s16 + $0x68] sm:$0xff]  ;;  %v322_v28 = vpack.c.bf16 %v296_v24, %v295_v23  ;;  %v299_v30 = vld [vmem:[%s1741_s16 + $0x70] sm:$0xff] }
  0x15   : > { %1502 = vmatprep.subr.bf16.mxu1 %v1528_v5  ;;  %v323_v29 = vpack.c.bf16 %v298_v27, %v297_v26  ;;  %v300_v31 = vld [vmem:[%s1741_s16 + $0x78] sm:$0xff]  ;;  %v301_v32 = vld [vmem:[%s1741_s16 + $0x80] sm:$0xff]  ;;  %v302_v33 = vld [vmem:[%s1741_s16 + $0x88] sm:$0xff] }
  0x16   : > { %1421 = vmatmul.mubr.msk.bf16.vlgmr.msra.gmra.mxu0 %vm356_vm0, %v318_v13  ;;  %v324_v34 = vpack.c.bf16 %v300_v31, %v299_v30  ;;  %v325_v35 = vpack.c.bf16 %v302_v33, %v301_v32  ;;  %v303_v36 = vld [vmem:[%s1741_s16 + $0x90] sm:$0xff]  ;;  %v304_v37 = vld [vmem:[%s1741_s16 + $0x98] sm:$0xff]  ;;  %v305_v38 = vld [vmem:[%s1741_s16 + $0xa0] sm:$0xff] }
  0x17   : > { %1424 = vmatprep.mubr.msk.bf16.mxu0 %vm356_vm0, %v319_v14  ;;  %1453 = vmatpush3.bf16.msra.mxu0 %v1526_v3  ;;  %v306_v39 = vld [vmem:[%s1741_s16 + $0xa8] sm:$0xff]  ;;  %v326_v40 = vpack.c.bf16 %v304_v37, %v303_v36  ;;  %v307_v42 = vld [vmem:[%s1741_s16 + $0xb0] sm:$0xff]  ;;  %v308_v43 = vld [vmem:[%s1741_s16 + $0xb8] sm:$0xff] }
  0x18   : > { %1454 = vmatprep.subr.bf16.mxu0 %v1527_v4  ;;  %1510 = vmatpush3.bf16.msra.mxu1 %v1528_v5  ;;  %v327_v41 = vpack.c.bf16 %v306_v39, %v305_v38  ;;  %v309_v44 = vld [vmem:[%s1741_s16 + $0xc0] sm:$0xff]  ;;  %v310_v45 = vld [vmem:[%s1741_s16 + $0xc8] sm:$0xff]  ;;  %v328_v46 = vpack.c.bf16 %v308_v43, %v307_v42  ;;  %v311_v48 = vld [vmem:[%s1741_s16 + $0xd0] sm:$0xff] }
  0x19   : > { %1503 = vmatprep.subr.bf16.mxu1 %v1529_v17  ;;  %v329_v47 = vpack.c.bf16 %v310_v45, %v309_v44  ;;  %v312_v49 = vld [vmem:[%s1741_s16 + $0xd8] sm:$0xff]  ;;  %v313_v50 = vld [vmem:[%s1741_s16 + $0xe0] sm:$0xff]  ;;  %v314_v51 = vld [vmem:[%s1741_s16 + $0xe8] sm:$0xff] }
  0x1a   : > { %v330_v52 = vpack.c.bf16 %v312_v49, %v311_v48  ;;  %v331_v53 = vpack.c.bf16 %v314_v51, %v313_v50  ;;  %v315_v54 = vld [vmem:[%s1741_s16 + $0xf0] sm:$0xff]  ;;  %v316_v55 = vld [vmem:[%s1741_s16 + $0xf8] sm:$0xff]  ;;  %v1533_v58 = vld [vmem:[%s2031_s3] sm:$0xff]   ;;  %s1942_s16 = scalar_lea.vmem %s2035_s7, %s1307_s13 }
  0x1b   : > { %1455 = vmatpush3.bf16.msra.mxu0 %v1527_v4  ;;  %v332_v56 = vpack.c.bf16 %v316_v55, %v315_v54  ;;  %v1812_v61 = vld [vmem:[%s2030_s2] ss:$0 sm:$0xff] }
  0x1c   : > { %1456 = vmatprep.subr.bf16.mxu0 %v1528_v5  ;;  %1511 = vmatpush3.bf16.msra.mxu1 %v1529_v17 }
  0x1d   : > { %1504 = vmatprep.subr.bf16.mxu1 %v1530_v22 }
  0x1e   : > { %1425 = vmatmul.mubr.msk.bf16.gmra.mxu0 %vm356_vm0, %v320_v20 }
  0x1f   : > { %1428 = vmatprep.mubr.msk.bf16.mxu0 %vm356_vm0, %v321_v21  ;;  %1457 = vmatpush3.bf16.msra.mxu0 %v1528_v5 }
  0x20   : > { %1458 = vmatprep.subr.bf16.mxu0 %v1529_v17  ;;  %1512 = vmatpush3.bf16.msra.mxu1 %v1530_v22 }
  0x21   : > { %1505 = vmatprep.subr.bf16.mxu1 %v1531_v25 }
  0x23   : > { %1459 = vmatpush3.bf16.msra.mxu0 %v1529_v17 }
  0x24   : > { %1460 = vmatprep.subr.bf16.mxu0 %v1530_v22  ;;  %1513 = vmatpush3.bf16.msra.mxu1 %v1531_v25 }
  0x25   : > { %1506 = vmatprep.subr.bf16.mxu1 %v1532_v57 }
  0x26   : > { %1429 = vmatmul.mubr.msk.bf16.gmra.mxu0 %vm356_vm0, %v322_v28 }
  0x27   : > { %1432 = vmatprep.mubr.msk.bf16.mxu0 %vm356_vm0, %v323_v29  ;;  %1461 = vmatpush3.bf16.msra.mxu0 %v1530_v22 }
  0x28   : > { %1462 = vmatprep.subr.bf16.mxu0 %v1531_v25  ;;  %1514 = vmatpush3.bf16.msra.mxu1 %v1532_v57 }
  0x29   : > { %1507 = vmatprep.subr.bf16.mxu1 %v1533_v58 }
  0x2b   : > { %1463 = vmatpush3.bf16.msra.mxu0 %v1531_v25 }
  0x2c   : > { %1464 = vmatprep.subr.bf16.mxu0 %v1532_v57  ;;  %1515 = vmatpush3.bf16.msra.mxu1 %v1533_v58 }
  0x2e   : > { %1433 = vmatmul.mubr.msk.bf16.gmra.mxu0 %vm356_vm0, %v324_v34 }
  0x2f   : > { %1436 = vmatprep.mubr.msk.bf16.mxu0 %vm356_vm0, %v325_v35  ;;  %1465 = vmatpush3.bf16.msra.mxu0 %v1532_v57 }
  0x30   : > { %1466 = vmatprep.subr.bf16.mxu0 %v1533_v58 }
  0x33   : > { %1467 = vmatpush3.bf16.msra.mxu0 %v1533_v58 }
  0x36   : > { %1437 = vmatmul.mubr.msk.bf16.gmra.mxu0 %vm356_vm0, %v326_v40 }
  0x37   : > { %1440 = vmatprep.mubr.msk.bf16.mxu0 %vm356_vm0, %v327_v41 }
  0x3e   : > { %1441 = vmatmul.mubr.msk.bf16.gmra.mxu0 %vm356_vm0, %v328_v46 }
  0x3f   : > { %1444 = vmatprep.mubr.msk.bf16.mxu0 %vm356_vm0, %v329_v47 }
  0x46   : > { %1445 = vmatmul.mubr.msk.bf16.gmra.mxu0 %vm356_vm0, %v330_v52 }
  0x47   : > { %1448 = vmatprep.mubr.msk.bf16.mxu0 %vm356_vm0, %v331_v53 }
  0x4e   : > { %1449 = vmatmul.mubr.msk.bf16.gmra.mxu0 %vm356_vm0, %v332_v56 }
  0xd6   : > { %v1422_v59 = vpop.f32.mrf.mxu0 }
  0xd7   : > { %v448_v1 = vadd.f32 %v1422_v59, %v1812_v61 }
  0xd8   : > { %v439_v60 = vpop.f32.mrf.mxu0 }
  0xd9   : > { %v440_v63 = vadd.f32 %v1812_v61, %v439_v60  ;;  %v568_v8 = vmax.f32 %v448_v1, 0.0 }
  0xda   : > { %v1423_v62 = vpop.f32.mrf.mxu0 }
  0xdb   : > { %v451_v0 = vadd.f32 %v1423_v62, %v1812_v61  ;;  %v566_v6 = vmax.f32 %v440_v63, 0.0 }
  0xdc   : > { %v442_v2 = vpop.f32.mrf.mxu0 }
  0xdd   : > { %v443_v3 = vadd.f32 %v1812_v61, %v442_v2  ;;  %v569_v4 = vmax.f32 %v451_v0, 0.0 }
  0xde   : > { %v1426_v5 = vpop.f32.mrf.mxu0 }
  0xdf   : > { %v567_v7 = vmax.f32 %v443_v3, 0.0  ;;  %v599_v11 = vpack.c.bf16 %v569_v4, %v568_v8  ;;  %v464_v15 = vadd.f32 %v1426_v5, %v1812_v61 }
  0xe0   : > { %v455_v9 = vpop.f32.mrf.mxu0 }
  0xe1   : > { %v598_v10 = vpack.c.bf16 %v567_v7, %v566_v6  ;;  %v456_v13 = vadd.f32 %v1812_v61, %v455_v9  ;;  %v572_v22 = vmax.f32 %v464_v15, 0.0 }
  0xe2   : > { %v1427_v12 = vpop.f32.mrf.mxu0 }
  0xe3   : > { %v467_v14 = vadd.f32 %v1427_v12, %v1812_v61  ;;  %1468 = vmatprep.mubr.bf16.mxu0 %v598_v10  ;;  %v570_v20 = vmax.f32 %v456_v13, 0.0 }
  0xe4   : > { %v458_v16 = vpop.f32.mrf.mxu0  ;;  %1469 = vmatmul.mubr.bf16.vlgmr.msra.gmra.mxu0 %v599_v11 }
  0xe5   : > { %v459_v17 = vadd.f32 %v1812_v61, %v458_v16  ;;  %v573_v18 = vmax.f32 %v467_v14, 0.0 }
  0xe6   : > { %v1430_v19 = vpop.f32.mrf.mxu0 }
  0xe7   : > { %v571_v21 = vmax.f32 %v459_v17, 0.0  ;;  %v601_v25 = vpack.c.bf16 %v573_v18, %v572_v22  ;;  %v480_v29 = vadd.f32 %v1430_v19, %v1812_v61 }
  0xe8   : > { %v471_v23 = vpop.f32.mrf.mxu0 }
  0xe9   : > { %v600_v24 = vpack.c.bf16 %v571_v21, %v570_v20  ;;  %v472_v27 = vadd.f32 %v1812_v61, %v471_v23  ;;  %v576_v36 = vmax.f32 %v480_v29, 0.0 }
  0xea   : > { %v1431_v26 = vpop.f32.mrf.mxu0 }
  0xeb   : > { %v483_v28 = vadd.f32 %v1431_v26, %v1812_v61  ;;  %1472 = vmatprep.mubr.bf16.mxu1 %v600_v24  ;;  %v574_v34 = vmax.f32 %v472_v27, 0.0 }
  0xec   : > { %v474_v30 = vpop.f32.mrf.mxu0  ;;  %1473 = vmatmul.mubr.bf16.vlgmr.msra.gmra.mxu1 %v601_v25 }
  0xed   : > { %v475_v31 = vadd.f32 %v1812_v61, %v474_v30  ;;  %v577_v32 = vmax.f32 %v483_v28, 0.0 }
  0xee   : > { %v1434_v33 = vpop.f32.mrf.mxu0 }
  0xef   : > { %v575_v35 = vmax.f32 %v475_v31, 0.0  ;;  %v603_v39 = vpack.c.bf16 %v577_v32, %v576_v36  ;;  %v496_v43 = vadd.f32 %v1434_v33, %v1812_v61 }
  0xf0   : > { %v487_v37 = vpop.f32.mrf.mxu0 }
  0xf1   : > { %v602_v38 = vpack.c.bf16 %v575_v35, %v574_v34  ;;  %v488_v41 = vadd.f32 %v1812_v61, %v487_v37  ;;  %v580_v50 = vmax.f32 %v496_v43, 0.0 }
  0xf2   : > { %v1435_v40 = vpop.f32.mrf.mxu0 }
  0xf3   : > { %v499_v42 = vadd.f32 %v1435_v40, %v1812_v61  ;;  %1476 = vmatprep.mubr.bf16.mxu1 %v602_v38  ;;  %v578_v48 = vmax.f32 %v488_v41, 0.0 }
  0xf4   : > { %v490_v44 = vpop.f32.mrf.mxu0  ;;  %1477 = vmatmul.mubr.bf16.gmra.mxu1 %v603_v39 }
  0xf5   : > { %v491_v45 = vadd.f32 %v1812_v61, %v490_v44  ;;  %v581_v46 = vmax.f32 %v499_v42, 0.0 }
  0xf6   : > { %v1438_v47 = vpop.f32.mrf.mxu0 }
  0xf7   : > { %v579_v49 = vmax.f32 %v491_v45, 0.0  ;;  %v605_v53 = vpack.c.bf16 %v581_v46, %v580_v50  ;;  %v512_v57 = vadd.f32 %v1438_v47, %v1812_v61  ;;  %v1849_v45 = vld [vmem:[%s2032_s4] ss:$0 sm:$0xff] }
  0xf8   : > { %v503_v51 = vpop.f32.mrf.mxu0 }
  0xf9   : > { %v604_v52 = vpack.c.bf16 %v579_v49, %v578_v48  ;;  %v504_v55 = vadd.f32 %v1812_v61, %v503_v51  ;;  %v584_v1 = vmax.f32 %v512_v57, 0.0 }
  0xfa   : > { %v1439_v54 = vpop.f32.mrf.mxu0 }
  0xfb   : > { %v515_v56 = vadd.f32 %v1439_v54, %v1812_v61  ;;  %1480 = vmatprep.mubr.bf16.mxu1 %v604_v52  ;;  %v582_v63 = vmax.f32 %v504_v55, 0.0 }
  0xfc   : > { %v506_v58 = vpop.f32.mrf.mxu0  ;;  %1481 = vmatmul.mubr.bf16.gmra.mxu1 %v605_v53 }
  0xfd   : > { %v507_v59 = vadd.f32 %v1812_v61, %v506_v58  ;;  %v585_v60 = vmax.f32 %v515_v56, 0.0 }
  0xfe   : > { %v1442_v62 = vpop.f32.mrf.mxu0 }
  0xff   : > { %v583_v0 = vmax.f32 %v507_v59, 0.0  ;;  %v607_v4 = vpack.c.bf16 %v585_v60, %v584_v1  ;;  %v528_v8 = vadd.f32 %v1442_v62, %v1812_v61 }
 0x100   : > { %v519_v2 = vpop.f32.mrf.mxu0 }
 0x101   : > { %v606_v3 = vpack.c.bf16 %v583_v0, %v582_v63  ;;  %v520_v6 = vadd.f32 %v1812_v61, %v519_v2  ;;  %v588_v15 = vmax.f32 %v528_v8, 0.0 }
 0x102   : > { %v1443_v5 = vpop.f32.mrf.mxu0 }
 0x103   : > { %v531_v7 = vadd.f32 %v1443_v5, %v1812_v61  ;;  %1484 = vmatprep.mubr.bf16.mxu1 %v606_v3  ;;  %v586_v13 = vmax.f32 %v520_v6, 0.0 }
 0x104   : > { %v522_v9 = vpop.f32.mrf.mxu0  ;;  %1485 = vmatmul.mubr.bf16.gmra.mxu1 %v607_v4 }
 0x105   : > { %v523_v10 = vadd.f32 %v1812_v61, %v522_v9  ;;  %v589_v11 = vmax.f32 %v531_v7, 0.0 }
 0x106   : > { %v1446_v12 = vpop.f32.mrf.mxu0 }
 0x107   : > { %v587_v14 = vmax.f32 %v523_v10, 0.0  ;;  %v609_v18 = vpack.c.bf16 %v589_v11, %v588_v15  ;;  %v544_v22 = vadd.f32 %v1446_v12, %v1812_v61 }
 0x108   : > { %v535_v16 = vpop.f32.mrf.mxu0 }
 0x109   : > { %v608_v17 = vpack.c.bf16 %v587_v14, %v586_v13  ;;  %v536_v20 = vadd.f32 %v1812_v61, %v535_v16  ;;  %v592_v29 = vmax.f32 %v544_v22, 0.0 }
 0x10a   : > { %v1447_v19 = vpop.f32.mrf.mxu0 }
 0x10b   : > { %v547_v21 = vadd.f32 %v1447_v19, %v1812_v61  ;;  %1488 = vmatprep.mubr.bf16.mxu1 %v608_v17  ;;  %v590_v27 = vmax.f32 %v536_v20, 0.0 }
 0x10c   : > { %v538_v23 = vpop.f32.mrf.mxu0  ;;  %1489 = vmatmul.mubr.bf16.gmra.mxu1 %v609_v18 }
 0x10d   : > { %v539_v24 = vadd.f32 %v1812_v61, %v538_v23  ;;  %v593_v25 = vmax.f32 %v547_v21, 0.0 }
 0x10e   : > { %v1450_v26 = vpop.f32.mrf.mxu0 }
 0x10f   : > { %v591_v28 = vmax.f32 %v539_v24, 0.0  ;;  %v611_v32 = vpack.c.bf16 %v593_v25, %v592_v29  ;;  %v560_v36 = vadd.f32 %v1450_v26, %v1812_v61 }
 0x110   : > { %v551_v30 = vpop.f32.mrf.mxu0 }
 0x111   : > { %v610_v31 = vpack.c.bf16 %v591_v28, %v590_v27  ;;  %v552_v34 = vadd.f32 %v1812_v61, %v551_v30  ;;  %v596_v42 = vmax.f32 %v560_v36, 0.0 }
 0x112   : > { %v1451_v33 = vpop.f32.mrf.mxu0 }
 0x113   : > { %v563_v35 = vadd.f32 %v1451_v33, %v1812_v61  ;;  %1492 = vmatprep.mubr.bf16.mxu1 %v610_v31  ;;  %v594_v40 = vmax.f32 %v552_v34, 0.0 }
 0x114   : > { %v554_v37 = vpop.f32.mrf.mxu0  ;;  %1493 = vmatmul.mubr.bf16.gmra.mxu1 %v611_v32 }
 0x115   : > { %v555_v38 = vadd.f32 %v1812_v61, %v554_v37  ;;  %v597_v39 = vmax.f32 %v563_v35, 0.0  ;;  %v1855_v61 = vld [vmem:[%s2033_s5] ss:$0 sm:$0xff] }
 0x117   : > { %v595_v41 = vmax.f32 %v555_v38, 0.0  ;;  %v613_v44 = vpack.c.bf16 %v597_v39, %v596_v42 }
 0x119   : > { %v612_v43 = vpack.c.bf16 %v595_v41, %v594_v40 }
 0x11b   : > { %1496 = vmatprep.mubr.bf16.mxu1 %v612_v43 }
 0x11c   : > { %1497 = vmatmul.mubr.bf16.gmra.mxu1 %v613_v44 }
 0x1a4   : > { %v1470_v46 = vpop.f32.mrf.mxu0 }
 0x1a5   : > { %v728_v47 = vadd.f32 %v1470_v46, %v1849_v45 }
 0x1a6   : > { %v719_v48 = vpop.f32.mrf.mxu0 }
 0x1a7   : > { %v848_v49 = vmax.f32 %v728_v47, 0.0  ;;  %v720_v50 = vadd.f32 %v1849_v45, %v719_v48 }
 0x1a8   : > { %v1471_v51 = vpop.f32.mrf.mxu0 }
 0x1a9   : > { %v846_v52 = vmax.f32 %v720_v50, 0.0  ;;  %v731_v53 = vadd.f32 %v1471_v51, %v1849_v45  ;;  %v887_v54 = vmul.f32 %v1855_v61, %v848_v49 }
 0x1aa   : > { %v722_v55 = vpop.f32.mrf.mxu0 }
 0x1ab   : > { %v849_v56 = vmax.f32 %v731_v53, 0.0  ;;  %v723_v57 = vadd.f32 %v1849_v45, %v722_v55  ;;  %921 = vadd.xlane.f32.xlu1 %v887_v54  ;;  %v885_v58 = vmul.f32 %v1855_v61, %v846_v52 }
 0x1ac   : > { %v1474_v59 = vpop.f32.mrf.mxu1 }
 0x1ad   : > { %v847_v60 = vmax.f32 %v723_v57, 0.0  ;;  %v744_v62 = vadd.f32 %v1474_v59, %v1849_v45  ;;  %917 = vadd.xlane.f32.xlu0 %v885_v58  ;;  %v888_v63 = vmul.f32 %v1855_v61, %v849_v56 }
 0x1ae   : > { %v735_v0 = vpop.f32.mrf.mxu1 }
 0x1af   : > { %v852_v1 = vmax.f32 %v744_v62, 0.0  ;;  %v736_v2 = vadd.f32 %v1849_v45, %v735_v0  ;;  %923 = vadd.xlane.f32.xlu1 %v888_v63  ;;  %v886_v3 = vmul.f32 %v1855_v61, %v847_v60 }
 0x1b0   : > { %v1475_v4 = vpop.f32.mrf.mxu1 }
 0x1b1   : > { %v747_v5 = vadd.f32 %v1475_v4, %v1849_v45  ;;  %919 = vadd.xlane.f32.xlu0 %v886_v3  ;;  %v850_v7 = vmax.f32 %v736_v2, 0.0  ;;  %v891_v10 = vmul.f32 %v1855_v61, %v852_v1 }
 0x1b2   : > { %v738_v6 = vpop.f32.mrf.mxu1 }
 0x1b3   : > { %v853_v8 = vmax.f32 %v747_v5, 0.0  ;;  %v739_v9 = vadd.f32 %v1849_v45, %v738_v6  ;;  %v889_v18 = vmul.f32 %v1855_v61, %v850_v7 }
 0x1b4   : > { %v1478_v11 = vpop.f32.mrf.mxu1 }
 0x1b5   : > { %v851_v12 = vmax.f32 %v739_v9, 0.0  ;;  %v760_v13 = vadd.f32 %v1478_v11, %v1849_v45  ;;  %929 = vadd.xlane.f32.xlu0 %v891_v10  ;;  %v892_v14 = vmul.f32 %v1855_v61, %v853_v8 }
 0x1b6   : > { %v751_v15 = vpop.f32.mrf.mxu1 }
 0x1b7   : > { %v856_v16 = vmax.f32 %v760_v13, 0.0  ;;  %v752_v17 = vadd.f32 %v1849_v45, %v751_v15  ;;  %931 = vadd.xlane.f32.xlu1 %v892_v14  ;;  %v890_v21 = vmul.f32 %v1855_v61, %v851_v12 }
 0x1b8   : > { %v1479_v19 = vpop.f32.mrf.mxu1 }
 0x1b9   : > { %v763_v20 = vadd.f32 %v1479_v19, %v1849_v45  ;;  %925 = vadd.xlane.f32.xlu0 %v889_v18  ;;  %v854_v23 = vmax.f32 %v752_v17, 0.0  ;;  %v895_v26 = vmul.f32 %v1855_v61, %v856_v16 }
 0x1ba   : > { %v754_v22 = vpop.f32.mrf.mxu1 }
 0x1bb   : > { %v857_v24 = vmax.f32 %v763_v20, 0.0  ;;  %v755_v25 = vadd.f32 %v1849_v45, %v754_v22  ;;  %927 = vadd.xlane.f32.xlu1 %v890_v21  ;;  %v893_v34 = vmul.f32 %v1855_v61, %v854_v23 }
 0x1bc   : > { %v1482_v27 = vpop.f32.mrf.mxu1 }
 0x1bd   : > { %v855_v28 = vmax.f32 %v755_v25, 0.0  ;;  %v776_v29 = vadd.f32 %v1482_v27, %v1849_v45  ;;  %937 = vadd.xlane.f32.xlu0 %v895_v26  ;;  %v896_v30 = vmul.f32 %v1855_v61, %v857_v24 }
 0x1be   : > { %v767_v31 = vpop.f32.mrf.mxu1 }
 0x1bf   : > { %v860_v32 = vmax.f32 %v776_v29, 0.0  ;;  %v768_v33 = vadd.f32 %v1849_v45, %v767_v31  ;;  %939 = vadd.xlane.f32.xlu1 %v896_v30  ;;  %v894_v37 = vmul.f32 %v1855_v61, %v855_v28 }
 0x1c0   : > { %v1483_v35 = vpop.f32.mrf.mxu1 }
 0x1c1   : > { %v779_v36 = vadd.f32 %v1483_v35, %v1849_v45  ;;  %933 = vadd.xlane.f32.xlu0 %v893_v34  ;;  %v858_v39 = vmax.f32 %v768_v33, 0.0  ;;  %v899_v42 = vmul.f32 %v1855_v61, %v860_v32 }
 0x1c2   : > { %v770_v38 = vpop.f32.mrf.mxu1 }
 0x1c3   : > { %v861_v40 = vmax.f32 %v779_v36, 0.0  ;;  %v771_v41 = vadd.f32 %v1849_v45, %v770_v38  ;;  %935 = vadd.xlane.f32.xlu1 %v894_v37  ;;  %v897_v51 = vmul.f32 %v1855_v61, %v858_v39 }
 0x1c4   : > { %v1486_v43 = vpop.f32.mrf.mxu1 }
 0x1c5   : > { %v859_v44 = vmax.f32 %v771_v41, 0.0  ;;  %v792_v46 = vadd.f32 %v1486_v43, %v1849_v45  ;;  %945 = vadd.xlane.f32.xlu0 %v899_v42  ;;  %v900_v47 = vmul.f32 %v1855_v61, %v861_v40 }
 0x1c6   : > { %v783_v48 = vpop.f32.mrf.mxu1 }
 0x1c7   : > { %v864_v49 = vmax.f32 %v792_v46, 0.0  ;;  %v784_v50 = vadd.f32 %v1849_v45, %v783_v48  ;;  %947 = vadd.xlane.f32.xlu1 %v900_v47  ;;  %v898_v54 = vmul.f32 %v1855_v61, %v859_v44 }
 0x1c8   : > { %v1487_v52 = vpop.f32.mrf.mxu1 }
 0x1c9   : > { %v795_v53 = vadd.f32 %v1487_v52, %v1849_v45  ;;  %941 = vadd.xlane.f32.xlu0 %v897_v51  ;;  %v862_v56 = vmax.f32 %v784_v50, 0.0  ;;  %v903_v59 = vmul.f32 %v1855_v61, %v864_v49  ;;  %v1920_v50 = vld [vmem:[#allocation2] ss:$0 sm:$0xff] }
 0x1ca   : > { %v786_v55 = vpop.f32.mrf.mxu1 }
 0x1cb   : > { %v865_v57 = vmax.f32 %v795_v53, 0.0  ;;  %v787_v58 = vadd.f32 %v1849_v45, %v786_v55  ;;  %943 = vadd.xlane.f32.xlu1 %v898_v54  ;;  %v901_v4 = vmul.f32 %v1855_v61, %v862_v56 }
 0x1cc   : > { %v1490_v60 = vpop.f32.mrf.mxu1 }
 0x1cd   : > { %v863_v62 = vmax.f32 %v787_v58, 0.0  ;;  %v808_v63 = vadd.f32 %v1490_v60, %v1849_v45  ;;  %953 = vadd.xlane.f32.xlu0 %v903_v59  ;;  %v904_v0 = vmul.f32 %v1855_v61, %v865_v57 }
 0x1ce   : > { %v799_v1 = vpop.f32.mrf.mxu1 }
 0x1cf   : > { %v868_v2 = vmax.f32 %v808_v63, 0.0  ;;  %v800_v3 = vadd.f32 %v1849_v45, %v799_v1  ;;  %955 = vadd.xlane.f32.xlu1 %v904_v0  ;;  %v902_v7 = vmul.f32 %v1855_v61, %v863_v62 }
 0x1d0   : > { %v1491_v5 = vpop.f32.mrf.mxu1 }
 0x1d1   : > { %v811_v6 = vadd.f32 %v1491_v5, %v1849_v45  ;;  %949 = vadd.xlane.f32.xlu0 %v901_v4  ;;  %v866_v9 = vmax.f32 %v800_v3, 0.0  ;;  %v907_v12 = vmul.f32 %v1855_v61, %v868_v2 }
 0x1d2   : > { %v802_v8 = vpop.f32.mrf.mxu1 }
 0x1d3   : > { %v869_v10 = vmax.f32 %v811_v6, 0.0  ;;  %v803_v11 = vadd.f32 %v1849_v45, %v802_v8  ;;  %951 = vadd.xlane.f32.xlu1 %v902_v7  ;;  %v905_v20 = vmul.f32 %v1855_v61, %v866_v9 }
 0x1d4   : > { %v1494_v13 = vpop.f32.mrf.mxu1 }
 0x1d5   : > { %v867_v14 = vmax.f32 %v803_v11, 0.0  ;;  %v824_v15 = vadd.f32 %v1494_v13, %v1849_v45  ;;  %961 = vadd.xlane.f32.xlu0 %v907_v12  ;;  %v908_v16 = vmul.f32 %v1855_v61, %v869_v10 }
 0x1d6   : > { %v815_v17 = vpop.f32.mrf.mxu1 }
 0x1d7   : > { %v872_v18 = vmax.f32 %v824_v15, 0.0  ;;  %v816_v19 = vadd.f32 %v1849_v45, %v815_v17  ;;  %963 = vadd.xlane.f32.xlu1 %v908_v16  ;;  %v906_v23 = vmul.f32 %v1855_v61, %v867_v14 }
 0x1d8   : > { %v1495_v21 = vpop.f32.mrf.mxu1 }
 0x1d9   : > { %v827_v22 = vadd.f32 %v1495_v21, %v1849_v45  ;;  %957 = vadd.xlane.f32.xlu0 %v905_v20  ;;  %v870_v25 = vmax.f32 %v816_v19, 0.0  ;;  %v911_v28 = vmul.f32 %v1855_v61, %v872_v18 }
 0x1da   : > { %v818_v24 = vpop.f32.mrf.mxu1 }
 0x1db   : > { %v873_v26 = vmax.f32 %v827_v22, 0.0  ;;  %v819_v27 = vadd.f32 %v1849_v45, %v818_v24  ;;  %959 = vadd.xlane.f32.xlu1 %v906_v23  ;;  %v909_v35 = vmul.f32 %v1855_v61, %v870_v25 }
 0x1dc   : > { %v1498_v29 = vpop.f32.mrf.mxu1 }
 0x1dd   : > { %v871_v30 = vmax.f32 %v819_v27, 0.0  ;;  %969 = vadd.xlane.f32.xlu0 %v911_v28  ;;  %v912_v31 = vmul.f32 %v1855_v61, %v873_v26  ;;  %v840_v33 = vadd.f32 %v1498_v29, %v1849_v45 }
 0x1de   : > { %v831_v32 = vpop.f32.mrf.mxu1 }
 0x1df   : > { %v832_v34 = vadd.f32 %v1849_v45, %v831_v32  ;;  %971 = vadd.xlane.f32.xlu1 %v912_v31  ;;  %v910_v39 = vmul.f32 %v1855_v61, %v871_v30  ;;  %v876_v41 = vmax.f32 %v840_v33, 0.0 }
 0x1e0   : > { %v1499_v36 = vpop.f32.mrf.mxu1 }
 0x1e1   : > { %v874_v37 = vmax.f32 %v832_v34, 0.0  ;;  %v843_v38 = vadd.f32 %v1499_v36, %v1849_v45  ;;  %965 = vadd.xlane.f32.xlu0 %v909_v35  ;;  %v915_v49 = vmul.f32 %v1855_v61, %v876_v41 }
 0x1e2   : > { %v834_v40 = vpop.f32.mrf.mxu1 }
 0x1e3   : > { %v877_v42 = vmax.f32 %v843_v38, 0.0  ;;  %v835_v43 = vadd.f32 %v1849_v45, %v834_v40  ;;  %967 = vadd.xlane.f32.xlu1 %v910_v39  ;;  %v913_v44 = vmul.f32 %v1855_v61, %v874_v37 }
 0x1e5   : > { %v875_v46 = vmax.f32 %v835_v43, 0.0  ;;  %973 = vadd.xlane.f32.xlu0 %v913_v44  ;;  %v916_v47 = vmul.f32 %v1855_v61, %v877_v42 }
 0x1e7   : > { %v914_v48 = vmul.f32 %v1855_v61, %v875_v46 }
 0x1e9   : > { %975 = vadd.xlane.f32.xlu1 %v914_v48  ;;  %977 = vadd.xlane.f32.xlu0 %v915_v49 }
 0x1ed   : > { %979 = vadd.xlane.f32.xlu1 %v916_v47 }
 0x234   : > { %v922_v51 = vpop.xlane.xlu1 %921 }
 0x235   : > { %v990_v52 = vadd.f32 %v1920_v50, %v922_v51 }
 0x236   : > { %v918_v45 = vpop.xlane.xlu0 %917 }
 0x237   : > { %v1342_v53 = vmul.f32 -1.442695, %v990_v52  ;;  %v988_v54 = vadd.f32 %v1920_v50, %v918_v45 }
 0x238   : > { %v924_v55 = vpop.xlane.xlu1 %923 }
 0x239   : > { %1534 = vpow2.f32 %v1342_v53  ;;  %v1340_v56 = vmul.f32 -1.442695, %v988_v54  ;;  %v991_v57 = vadd.f32 %v1920_v50, %v924_v55 }
 0x23a   : > { %v920_v58 = vpop.xlane.xlu0 %919 }
 0x23b   : > { %1536 = vpow2.f32 %v1340_v56  ;;  %v1343_v61 = vmul.f32 -1.442695, %v991_v57  ;;  %v989_v59 = vadd.f32 %v1920_v50, %v920_v58 }
 0x23d   : > { %1538 = vpow2.f32 %v1343_v61  ;;  %v1341_v60 = vmul.f32 -1.442695, %v989_v59 }
 0x23e   : > { %v930_v62 = vpop.xlane.xlu0 %929 }
 0x23f   : > { %1540 = vpow2.f32 %v1341_v60  ;;  %v994_v63 = vadd.f32 %v1920_v50, %v930_v62 }
 0x240   : > { %v932_v0 = vpop.xlane.xlu1 %931 }
 0x241   : > { %v1346_v1 = vmul.f32 -1.442695, %v994_v63  ;;  %v995_v2 = vadd.f32 %v1920_v50, %v932_v0 }
 0x242   : > { %v926_v3 = vpop.xlane.xlu0 %925 }
 0x243   : > { %1542 = vpow2.f32 %v1346_v1  ;;  %v1347_v4 = vmul.f32 -1.442695, %v995_v2  ;;  %v992_v5 = vadd.f32 %v1920_v50, %v926_v3 }
 0x244   : > { %v928_v6 = vpop.xlane.xlu1 %927 }
 0x245   : > { %1544 = vpow2.f32 %v1347_v4  ;;  %v1344_v7 = vmul.f32 -1.442695, %v992_v5  ;;  %v993_v8 = vadd.f32 %v1920_v50, %v928_v6 }
 0x246   : > { %v1535_v9 = vpop.eup %1534  ;;  %v938_v10 = vpop.xlane.xlu0 %937 }
 0x247   : > { %v1118_v11 = vadd.f32 1.0, %v1535_v9  ;;  %1546 = vpow2.f32 %v1344_v7  ;;  %v1345_v12 = vmul.f32 -1.442695, %v993_v8  ;;  %v998_v13 = vadd.f32 %v1920_v50, %v938_v10 }
 0x248   : > { %v1537_v14 = vpop.eup %1536  ;;  %v940_v15 = vpop.xlane.xlu1 %939 }
 0x249   : > { %1548 = vrcp.f32 %v1118_v11  ;;  %v1116_v16 = vadd.f32 1.0, %v1537_v14  ;;  %v1350_v17 = vmul.f32 -1.442695, %v998_v13  ;;  %v999_v18 = vadd.f32 %v1920_v50, %v940_v15 }
 0x24a   : > { %v1539_v19 = vpop.eup %1538  ;;  %1550 = vpow2.f32 %v1345_v12  ;;  %v934_v20 = vpop.xlane.xlu0 %933 }
 0x24b   : > { %1552 = vrcp.f32 %v1116_v16  ;;  %v1119_v21 = vadd.f32 1.0, %v1539_v19  ;;  %v1351_v22 = vmul.f32 -1.442695, %v999_v18  ;;  %v996_v23 = vadd.f32 %v1920_v50, %v934_v20 }
 0x24c   : > { %v1541_v24 = vpop.eup %1540  ;;  %1554 = vpow2.f32 %v1350_v17  ;;  %v936_v25 = vpop.xlane.xlu1 %935 }
 0x24d   : > { %1556 = vrcp.f32 %v1119_v21  ;;  %v1117_v26 = vadd.f32 1.0, %v1541_v24  ;;  %v1348_v27 = vmul.f32 -1.442695, %v996_v23  ;;  %v997_v28 = vadd.f32 %v1920_v50, %v936_v25 }
 0x24e   : > { %1558 = vpow2.f32 %v1351_v22  ;;  %v946_v29 = vpop.xlane.xlu0 %945 }
 0x24f   : > { %1560 = vrcp.f32 %v1117_v26  ;;  %v1349_v30 = vmul.f32 -1.442695, %v997_v28  ;;  %v1002_v31 = vadd.f32 %v1920_v50, %v946_v29 }
 0x250   : > { %v1543_v32 = vpop.eup %1542  ;;  %1562 = vpow2.f32 %v1348_v27  ;;  %v948_v33 = vpop.xlane.xlu1 %947 }
 0x251   : > { %v1122_v34 = vadd.f32 1.0, %v1543_v32  ;;  %1564 = vpow2.f32 %v1349_v30  ;;  %v1354_v35 = vmul.f32 -1.442695, %v1002_v31  ;;  %v1003_v36 = vadd.f32 %v1920_v50, %v948_v33 }
 0x252   : > { %v1545_v37 = vpop.eup %1544  ;;  %v942_v38 = vpop.xlane.xlu0 %941 }
 0x253   : > { %1566 = vrcp.f32 %v1122_v34  ;;  %v1123_v39 = vadd.f32 1.0, %v1545_v37  ;;  %v1355_v40 = vmul.f32 -1.442695, %v1003_v36  ;;  %v1000_v41 = vadd.f32 %v1920_v50, %v942_v38 }
 0x254   : > { %v1547_v42 = vpop.eup %1546  ;;  %1568 = vpow2.f32 %v1354_v35  ;;  %v944_v43 = vpop.xlane.xlu1 %943 }
 0x255   : > { %1570 = vrcp.f32 %v1123_v39  ;;  %v1120_v44 = vadd.f32 1.0, %v1547_v42  ;;  %v1352_v46 = vmul.f32 -1.442695, %v1000_v41  ;;  %v1001_v47 = vadd.f32 %v1920_v50, %v944_v43 }
 0x256   : > { %v1549_v48 = vpop.eup %1548  ;;  %1572 = vpow2.f32 %v1355_v40  ;;  %v954_v49 = vpop.xlane.xlu0 %953 }
 0x257   : > { %v1551_v51 = vpop.eup %1550  ;;  %1215 = vst.msk [vmem:[%s1942_s16 + $0x10] sm:$0xff] %vm1212_vm1, %v1549_v48  ;;  %1574 = vrcp.f32 %v1120_v44  ;;  %v1353_v52 = vmul.f32 -1.442695, %v1001_v47  ;;  %v1006_v45 = vadd.f32 %v1920_v50, %v954_v49 }
 0x258   : > { %v1553_v53 = vpop.eup %1552  ;;  %v1121_v54 = vadd.f32 1.0, %v1551_v51  ;;  %1576 = vpow2.f32 %v1352_v46  ;;  %v956_v55 = vpop.xlane.xlu1 %955 }
 0x259   : > { %v1555_v56 = vpop.eup %1554  ;;  %1213 = vst.msk [vmem:[%s1942_s16] sm:$0xff] %vm1212_vm1, %v1553_v53  ;;  %1578 = vpow2.f32 %v1353_v52  ;;  %v1358_v57 = vmul.f32 -1.442695, %v1006_v45  ;;  %v1007_v58 = vadd.f32 %v1920_v50, %v956_v55 }
 0x25a   : > { %v1557_v61 = vpop.eup %1556  ;;  %1580 = vrcp.f32 %v1121_v54  ;;  %v1126_v59 = vadd.f32 1.0, %v1555_v56  ;;  %v950_v60 = vpop.xlane.xlu0 %949 }
 0x25b   : > { %v1559_v62 = vpop.eup %1558  ;;  %1216 = vst.msk [vmem:[%s1942_s16 + $0x18] sm:$0xff] %vm1212_vm1, %v1557_v61  ;;  %1582 = vpow2.f32 %v1358_v57  ;;  %v1359_v63 = vmul.f32 -1.442695, %v1007_v58  ;;  %v1004_v0 = vadd.f32 %v1920_v50, %v950_v60 }
 0x25c   : > { %v1561_v1 = vpop.eup %1560  ;;  %1584 = vrcp.f32 %v1126_v59  ;;  %v1127_v2 = vadd.f32 1.0, %v1559_v62  ;;  %v952_v3 = vpop.xlane.xlu1 %951 }
 0x25d   : > { %v1563_v4 = vpop.eup %1562  ;;  %1214 = vst.msk [vmem:[%s1942_s16 + $0x8] sm:$0xff] %vm1212_vm1, %v1561_v1  ;;  %1586 = vpow2.f32 %v1359_v63  ;;  %v1356_v5 = vmul.f32 -1.442695, %v1004_v0  ;;  %v1005_v6 = vadd.f32 %v1920_v50, %v952_v3 }
 0x25e   : > { %v1565_v7 = vpop.eup %1564  ;;  %1588 = vrcp.f32 %v1127_v2  ;;  %v1124_v8 = vadd.f32 1.0, %v1563_v4  ;;  %v962_v9 = vpop.xlane.xlu0 %961 }
 0x25f   : > { %v1125_v10 = vadd.f32 1.0, %v1565_v7  ;;  %1590 = vpow2.f32 %v1356_v5  ;;  %v1357_v11 = vmul.f32 -1.442695, %v1005_v6  ;;  %v1010_v12 = vadd.f32 %v1920_v50, %v962_v9 }
 0x260   : > { %v1567_v13 = vpop.eup %1566  ;;  %1592 = vrcp.f32 %v1124_v8  ;;  %v964_v14 = vpop.xlane.xlu1 %963 }
 0x261   : > { %v1569_v15 = vpop.eup %1568  ;;  %1219 = vst.msk [vmem:[%s1942_s16 + $0x30] sm:$0xff] %vm1212_vm1, %v1567_v13  ;;  %1594 = vrcp.f32 %v1125_v10  ;;  %v1362_v16 = vmul.f32 -1.442695, %v1010_v12  ;;  %v1011_v17 = vadd.f32 %v1920_v50, %v964_v14 }
 0x262   : > { %v1571_v18 = vpop.eup %1570  ;;  %v1130_v19 = vadd.f32 1.0, %v1569_v15  ;;  %1596 = vpow2.f32 %v1357_v11  ;;  %v958_v20 = vpop.xlane.xlu0 %957 }
 0x263   : > { %v1573_v21 = vpop.eup %1572  ;;  %1220 = vst.msk [vmem:[%s1942_s16 + $0x38] sm:$0xff] %vm1212_vm1, %v1571_v18  ;;  %1598 = vpow2.f32 %v1362_v16  ;;  %v1363_v22 = vmul.f32 -1.442695, %v1011_v17  ;;  %v1008_v23 = vadd.f32 %v1920_v50, %v958_v20 }
 0x264   : > { %v1575_v24 = vpop.eup %1574  ;;  %1600 = vrcp.f32 %v1130_v19  ;;  %v1131_v25 = vadd.f32 1.0, %v1573_v21  ;;  %v960_v26 = vpop.xlane.xlu1 %959 }
 0x265   : > { %v1577_v27 = vpop.eup %1576  ;;  %1217 = vst.msk [vmem:[%s1942_s16 + $0x20] sm:$0xff] %vm1212_vm1, %v1575_v24  ;;  %1602 = vpow2.f32 %v1363_v22  ;;  %v1360_v28 = vmul.f32 -1.442695, %v1008_v23  ;;  %v1009_v29 = vadd.f32 %v1920_v50, %v960_v26 }
 0x266   : > { %v1579_v30 = vpop.eup %1578  ;;  %1604 = vrcp.f32 %v1131_v25  ;;  %v1128_v31 = vadd.f32 1.0, %v1577_v27  ;;  %v970_v32 = vpop.xlane.xlu0 %969 }
 0x267   : > { %v1581_v33 = vpop.eup %1580  ;;  %v1129_v34 = vadd.f32 1.0, %v1579_v30  ;;  %1606 = vpow2.f32 %v1360_v28  ;;  %v1361_v35 = vmul.f32 -1.442695, %v1009_v29  ;;  %v1014_v36 = vadd.f32 %v1920_v50, %v970_v32 }
 0x268   : > { %v1583_v37 = vpop.eup %1582  ;;  %1218 = vst.msk [vmem:[%s1942_s16 + $0x28] sm:$0xff] %vm1212_vm1, %v1581_v33  ;;  %1608 = vrcp.f32 %v1128_v31  ;;  %v972_v38 = vpop.xlane.xlu1 %971 }
 0x269   : > { %v1585_v39 = vpop.eup %1584  ;;  %1610 = vrcp.f32 %v1129_v34  ;;  %v1134_v40 = vadd.f32 1.0, %v1583_v37  ;;  %v1366_v41 = vmul.f32 -1.442695, %v1014_v36  ;;  %v1015_v42 = vadd.f32 %v1920_v50, %v972_v38 }
 0x26a   : > { %v1587_v43 = vpop.eup %1586  ;;  %1223 = vst.msk [vmem:[%s1942_s16 + $0x50] sm:$0xff] %vm1212_vm1, %v1585_v39  ;;  %1612 = vpow2.f32 %v1361_v35  ;;  %v966_v44 = vpop.xlane.xlu0 %965 }
 0x26b   : > { %v1589_v46 = vpop.eup %1588  ;;  %1614 = vrcp.f32 %v1134_v40  ;;  %v1135_v47 = vadd.f32 1.0, %v1587_v43  ;;  %v1367_v48 = vmul.f32 -1.442695, %v1015_v42  ;;  %v1012_v49 = vadd.f32 %v1920_v50, %v966_v44 }
 0x26c   : > { %v1591_v51 = vpop.eup %1590  ;;  %1224 = vst.msk [vmem:[%s1942_s16 + $0x58] sm:$0xff] %vm1212_vm1, %v1589_v46  ;;  %1616 = vpow2.f32 %v1366_v41  ;;  %v968_v52 = vpop.xlane.xlu1 %967 }
 0x26d   : > { %v1593_v45 = vpop.eup %1592  ;;  %1618 = vrcp.f32 %v1135_v47  ;;  %v1132_v53 = vadd.f32 1.0, %v1591_v51  ;;  %v1364_v54 = vmul.f32 -1.442695, %v1012_v49  ;;  %v1013_v55 = vadd.f32 %v1920_v50, %v968_v52 }
 0x26e   : > { %v1595_v56 = vpop.eup %1594  ;;  %1221 = vst.msk [vmem:[%s1942_s16 + $0x40] sm:$0xff] %vm1212_vm1, %v1593_v45  ;;  %1620 = vpow2.f32 %v1367_v48  ;;  %v974_v57 = vpop.xlane.xlu0 %973 }
 0x26f   : > { %v1597_v58 = vpop.eup %1596  ;;  %1222 = vst.msk [vmem:[%s1942_s16 + $0x48] sm:$0xff] %vm1212_vm1, %v1595_v56  ;;  %1622 = vrcp.f32 %v1132_v53  ;;  %v1365_v61 = vmul.f32 -1.442695, %v1013_v55  ;;  %v1016_v59 = vadd.f32 %v1920_v50, %v974_v57 }
 0x270   : > { %v1599_v60 = vpop.eup %1598  ;;  %v1133_v62 = vadd.f32 1.0, %v1597_v58  ;;  %1624 = vpow2.f32 %v1364_v54 }
 0x271   : > { %v1601_v63 = vpop.eup %1600  ;;  %v1138_v0 = vadd.f32 1.0, %v1599_v60  ;;  %1626 = vpow2.f32 %v1365_v61  ;;  %v1368_v1 = vmul.f32 -1.442695, %v1016_v59 }
 0x272   : > { %v1603_v2 = vpop.eup %1602  ;;  %1227 = vst.msk [vmem:[%s1942_s16 + $0x70] sm:$0xff] %vm1212_vm1, %v1601_v63  ;;  %1628 = vrcp.f32 %v1133_v62  ;;  %v976_v3 = vpop.xlane.xlu1 %975 }
 0x273   : > { %v978_v4 = vpop.xlane.xlu0 %977  ;;  %v1605_v5 = vpop.eup %1604  ;;  %1630 = vrcp.f32 %v1138_v0  ;;  %v1139_v6 = vadd.f32 1.0, %v1603_v2  ;;  %v1017_v7 = vadd.f32 %v1920_v50, %v976_v3 }
 0x274   : > { %v1018_v8 = vadd.f32 %v1920_v50, %v978_v4  ;;  %v1607_v9 = vpop.eup %1606  ;;  %1228 = vst.msk [vmem:[%s1942_s16 + $0x78] sm:$0xff] %vm1212_vm1, %v1605_v5  ;;  %1632 = vpow2.f32 %v1368_v1 }
 0x275   : > { %v1609_v10 = vpop.eup %1608  ;;  %1634 = vrcp.f32 %v1139_v6  ;;  %v1136_v11 = vadd.f32 1.0, %v1607_v9  ;;  %v1369_v12 = vmul.f32 -1.442695, %v1017_v7 }
 0x276   : > { %v1370_v13 = vmul.f32 -1.442695, %v1018_v8  ;;  %v1611_v14 = vpop.eup %1610  ;;  %1225 = vst.msk [vmem:[%s1942_s16 + $0x60] sm:$0xff] %vm1212_vm1, %v1609_v10  ;;  %v980_v15 = vpop.xlane.xlu1 %979 }
 0x277   : > { %v1613_v16 = vpop.eup %1612  ;;  %1226 = vst.msk [vmem:[%s1942_s16 + $0x68] sm:$0xff] %vm1212_vm1, %v1611_v14  ;;  %1636 = vrcp.f32 %v1136_v11  ;;  %v1019_v17 = vadd.f32 %v1920_v50, %v980_v15 }
 0x278   : > { %v1615_v18 = vpop.eup %1614  ;;  %v1137_v19 = vadd.f32 1.0, %v1613_v16  ;;  %1638 = vpow2.f32 %v1369_v12 }
 0x279   : > { %v1617_v20 = vpop.eup %1616  ;;  %1231 = vst.msk [vmem:[%s1942_s16 + $0x90] sm:$0xff] %vm1212_vm1, %v1615_v18  ;;  %1640 = vpow2.f32 %v1370_v13  ;;  %v1371_v21 = vmul.f32 -1.442695, %v1019_v17 }
 0x27a   : > { %v1619_v22 = vpop.eup %1618  ;;  %1642 = vrcp.f32 %v1137_v19  ;;  %v1142_v23 = vadd.f32 1.0, %v1617_v20 }
 0x27b   : > { %v1621_v24 = vpop.eup %1620  ;;  %1232 = vst.msk [vmem:[%s1942_s16 + $0x98] sm:$0xff] %vm1212_vm1, %v1619_v22  ;;  %1644 = vpow2.f32 %v1371_v21 }
 0x27c   : > { %v1623_v25 = vpop.eup %1622  ;;  %1646 = vrcp.f32 %v1142_v23  ;;  %v1143_v50 = vadd.f32 1.0, %v1621_v24 }
 0x27d   : > { %v1625_v26 = vpop.eup %1624  ;;  %1229 = vst.msk [vmem:[%s1942_s16 + $0x80] sm:$0xff] %vm1212_vm1, %v1623_v25 }
 0x27e   : > { %v1627_v27 = vpop.eup %1626  ;;  %1648 = vrcp.f32 %v1143_v50  ;;  %v1140_v28 = vadd.f32 1.0, %v1625_v26 }
 0x27f   : > { %v1629_v29 = vpop.eup %1628  ;;  %v1141_v30 = vadd.f32 1.0, %v1627_v27 }
 0x280   : > { %v1631_v31 = vpop.eup %1630  ;;  %1230 = vst.msk [vmem:[%s1942_s16 + $0x88] sm:$0xff] %vm1212_vm1, %v1629_v29  ;;  %1650 = vrcp.f32 %v1140_v28 }
 0x281   : > { %v1633_v32 = vpop.eup %1632  ;;  %1235 = vst.msk [vmem:[%s1942_s16 + $0xb0] sm:$0xff] %vm1212_vm1, %v1631_v31  ;;  %1652 = vrcp.f32 %v1141_v30 }
 0x282   : > { %v1635_v33 = vpop.eup %1634  ;;  %v1144_v34 = vadd.f32 1.0, %v1633_v32 }
 0x283   : > { %1236 = vst.msk [vmem:[%s1942_s16 + $0xb8] sm:$0xff] %vm1212_vm1, %v1635_v33 }
 0x284   : > { %v1637_v35 = vpop.eup %1636  ;;  %1654 = vrcp.f32 %v1144_v34 }
 0x285   : > { %v1639_v36 = vpop.eup %1638  ;;  %1233 = vst.msk [vmem:[%s1942_s16 + $0xa0] sm:$0xff] %vm1212_vm1, %v1637_v35 }
 0x286   : > { %v1641_v37 = vpop.eup %1640  ;;  %v1145_v38 = vadd.f32 1.0, %v1639_v36 }
 0x287   : > { %v1643_v39 = vpop.eup %1642  ;;  %v1146_v40 = vadd.f32 1.0, %v1641_v37 }
 0x288   : > { %v1645_v41 = vpop.eup %1644  ;;  %1234 = vst.msk [vmem:[%s1942_s16 + $0xa8] sm:$0xff] %vm1212_vm1, %v1643_v39  ;;  %1656 = vrcp.f32 %v1145_v38 }
 0x289   : > { %v1647_v42 = vpop.eup %1646  ;;  %1658 = vrcp.f32 %v1146_v40  ;;  %v1147_v43 = vadd.f32 1.0, %v1645_v41 }
 0x28a   : > { %1239 = vst.msk [vmem:[%s1942_s16 + $0xd0] sm:$0xff] %vm1212_vm1, %v1647_v42 }
 0x28b   : > { %v1649_v44 = vpop.eup %1648  ;;  %1660 = vrcp.f32 %v1147_v43 }
 0x28c   : > { %1240 = vst.msk [vmem:[%s1942_s16 + $0xd8] sm:$0xff] %vm1212_vm1, %v1649_v44 }
 0x28d   : > { %v1651_v46 = vpop.eup %1650 }
 0x28e   : > { %v1653_v47 = vpop.eup %1652  ;;  %1237 = vst.msk [vmem:[%s1942_s16 + $0xc0] sm:$0xff] %vm1212_vm1, %v1651_v46 }
 0x28f   : > { %1238 = vst.msk [vmem:[%s1942_s16 + $0xc8] sm:$0xff] %vm1212_vm1, %v1653_v47 }
 0x291   : > { %v1655_v48 = vpop.eup %1654 }
 0x292   : > { %1241 = vst.msk [vmem:[%s1942_s16 + $0xe0] sm:$0xff] %vm1212_vm1, %v1655_v48 }
 0x295   : > { %v1657_v49 = vpop.eup %1656 }
 0x296   : > { %v1659_v51 = vpop.eup %1658  ;;  %1242 = vst.msk [vmem:[%s1942_s16 + $0xe8] sm:$0xff] %vm1212_vm1, %v1657_v49 }
 0x297   : > { %1243 = vst.msk [vmem:[%s1942_s16 + $0xf0] sm:$0xff] %vm1212_vm1, %v1659_v51 }
 0x298   : > { %v1661_v52 = vpop.eup %1660 }
 0x299   : > { %1244 = vst.msk [vmem:[%s1942_s16 + $0xf8] sm:$0xff] %vm1212_vm1, %v1661_v52 }
 0x29a PF: > { %s19_s26 = sadd.s32 1, %s1668_s26  }
 0x29b   : > { %p16_p4 = scmp.ge.s32.totalorder %s19_s26, 6  }
 0x29d   :  { %18 = sbr.rel (!%p16_p4) target bundleno = 3 (0x3), region = 78 }

</bundles_post_ra>
